<compile_context>
chip_gen: v7x
topology: tpu7x:2x2x1
jax: 0.10.0
libtpu: 0.0.40
codegen_flags: <defaults>
</compile_context>

<pallas_src>
import math

import jax
import jax.numpy as jnp
from jax.experimental import pallas as pl
from jax.experimental.pallas import tpu as pltpu


def _round_up(x, m):
    return ((x + m - 1) // m) * m


def _model_dims(N, M, K):
    fc_dims = [(M, 4 * K), (4 * K, 3 * K), (3 * K, 5 * K), (5 * K, 3 * K),
               (3 * K, 3 * K), (3 * K, 2 * K), (2 * K, K)]
    width = _round_up(max([N, M, 3 * M] + [d for pair in fc_dims for d in pair]), 128)
    return fc_dims, width


# ----------------------------------------------------------------------------
# Fused kernel: normalize -> L packed-gate GRU cells -> 7-layer ReLU-MLP head.
# ----------------------------------------------------------------------------
def _make_gruann_kernel(L, n_fc, M, Tp, W, gh_off, h0_off, bias_off):
    def kernel(x_ref, w_ref, aux_ref, out_ref):
        x = x_ref[...]                                        # (Tp, W) f32
        # F.normalize over the size-1 seq dim == elementwise x / max(|x|, 1e-12).
        h = x / jnp.maximum(jnp.abs(x), 1e-12)

        for l in range(L):
            wi = w_ref[l * W:(l + 1) * W, :]                  # (W, W) bf16, gates packed
            bi = aux_ref[bias_off + l:bias_off + l + 1, :]    # (1, W)  f32
            gh = aux_ref[gh_off + l * Tp:gh_off + (l + 1) * Tp, :]      # (Tp, W) f32
            h_prev = aux_ref[h0_off + l * Tp:h0_off + (l + 1) * Tp, :]  # (Tp, W) f32

            # Single packed dot per layer: bf16 x bf16 -> f32 accumulate.
            gi = jnp.dot(h.astype(jnp.bfloat16), wi,
                         preferred_element_type=jnp.float32) + bi
            s = gi + gh                                       # packed r|z|n pre-acts
            # Packed gate layout: lanes [0:M)=r, [M:2M)=z, [2M:3M)=n.
            r = jax.nn.sigmoid(s[:, 0:M])
            z = jax.nn.sigmoid(s[:, M:2 * M])
            n = jnp.tanh(gi[:, 2 * M:3 * M] + r * gh[:, 2 * M:3 * M])
            h_m = (1.0 - z) * n + z * h_prev[:, 0:M]          # (Tp, M)
            # Back to a lane-dense (Tp, W) activation; padding is exactly zero so
            # the zero-padded weight rows downstream keep the result exact.
            h = jnp.concatenate(
                [h_m, jnp.zeros((Tp, W - M), jnp.float32)], axis=1)

        for i in range(n_fc):
            w = w_ref[(L + i) * W:(L + i + 1) * W, :]         # (W, W) bf16
            b = aux_ref[bias_off + L + i:bias_off + L + i + 1, :]
            h = jnp.maximum(h, 0.0)                           # ReLU precedes every fc
            h = jnp.dot(h.astype(jnp.bfloat16), w,
                        preferred_element_type=jnp.float32) + b

        out_ref[...] = h                                      # (Tp, W) lane-dense store
    return kernel


# ----------------------------------------------------------------------------
# Parameter construction (deterministic, PyTorch-style init ranges), packed and
# padded into two device slabs. Zero padding never affects the real outputs.
# ----------------------------------------------------------------------------
def init_params(key, N, M, L, K, T):
    fc_dims, W = _model_dims(N, M, K)
    Tp = _round_up(T, 8)
    n_fc = len(fc_dims)
    k_gru = 1.0 / math.sqrt(M)

    raw = {"gru": [], "fc": []}
    for layer in range(L):
        d_in = N if layer == 0 else M
        key, k1, k2, k3, k4 = jax.random.split(key, 5)
        raw["gru"].append((
            jax.random.uniform(k1, (3, d_in, M), jnp.float32, -k_gru, k_gru),  # W_i (r,z,n)
            jax.random.uniform(k2, (3, M, M), jnp.float32, -k_gru, k_gru),     # W_h (r,z,n)
            jax.random.uniform(k3, (3, M), jnp.float32, -k_gru, k_gru),        # b_i
            jax.random.uniform(k4, (3, M), jnp.float32, -k_gru, k_gru),        # b_h
        ))
    for (d_in, d_out) in fc_dims:
        key, k1, k2 = jax.random.split(key, 3)
        k_fc = 1.0 / math.sqrt(d_in)
        raw["fc"].append((
            jax.random.uniform(k1, (d_in, d_out), jnp.float32, -k_fc, k_fc),
            jax.random.uniform(k2, (d_out,), jnp.float32, -k_fc, k_fc),
        ))

    # TODO(synk): torch draws h0 per forward call; drawn once here (deterministic),
    # which is what allows the h0 @ W_h + b_h branch to be precomputed below.
    key, kh = jax.random.split(key)
    h0 = jax.random.normal(kh, (L, T, M), jnp.float32)

    # --- bf16 weight slab: (L + n_fc) blocks of (W, W), zero padded ---
    w_slab = jnp.zeros(((L + n_fc) * W, W), jnp.float32)
    for l, (wi, wh, bi, bh) in enumerate(raw["gru"]):
        d_in = wi.shape[1]
        for g in range(3):                     # packed gates: lanes [g*M, (g+1)*M)
            w_slab = w_slab.at[l * W:l * W + d_in, g * M:(g + 1) * M].set(wi[g])
    for i, (w, b) in enumerate(raw["fc"]):
        r0 = (L + i) * W
        w_slab = w_slab.at[r0:r0 + w.shape[0], :w.shape[1]].set(w)
    w_slab = w_slab.astype(jnp.bfloat16)

    # --- f32 aux slab: [ gh (precomputed h0 branch) | h0 | bias rows ] ---
    gh_off, h0_off, bias_off = 0, L * Tp, 2 * L * Tp
    aux = jnp.zeros((bias_off + _round_up(L + n_fc, 8), W), jnp.float32)
    for l, (wi, wh, bi, bh) in enumerate(raw["gru"]):
        gh_l = jnp.concatenate([h0[l] @ wh[g] + bh[g] for g in range(3)], axis=1)
        aux = aux.at[gh_off + l * Tp:gh_off + l * Tp + T, :3 * M].set(gh_l)
        aux = aux.at[h0_off + l * Tp:h0_off + l * Tp + T, :M].set(h0[l])
        aux = aux.at[bias_off + l, :3 * M].set(bi.reshape(-1))
    for i, (w, b) in enumerate(raw["fc"]):
        aux = aux.at[bias_off + L + i, :b.shape[0]].set(b)

    return {"w_slab": w_slab, "aux": aux, "raw": raw, "h0": h0}


# ----------------------------------------------------------------------------
# Forward wrapper: pad input (single jnp.pad), one pallas_call, strip padding.
# ----------------------------------------------------------------------------
def make_forward(N, M, L, K, T):
    fc_dims, W = _model_dims(N, M, K)
    Tp = _round_up(T, 8)
    n_fc = len(fc_dims)
    gh_off, h0_off, bias_off = 0, L * Tp, 2 * L * Tp
    kernel = _make_gruann_kernel(L, n_fc, M, Tp, W, gh_off, h0_off, bias_off)
    vmem = pl.BlockSpec(memory_space=pltpu.MemorySpace.VMEM)

    @jax.jit
    def forward(x, w_slab, aux):
        x2 = x.reshape(-1, N).astype(jnp.float32)   # == X.view(-1, 1, N), seq dim squeezed
        x_p = jnp.pad(x2, ((0, Tp - x2.shape[0]), (0, W - N)))
        out_p = pl.pallas_call(
            kernel,
            out_shape=jax.ShapeDtypeStruct((Tp, W), jnp.float32),
            in_specs=[vmem, vmem, vmem],
            out_specs=vmem,
        )(x_p, w_slab, aux)
        return out_p[:x2.shape[0], :K]

    return forward


# ----------------------------------------------------------------------------
# Pure-JAX f32 reference (same math, no padding / packing / bf16).
# ----------------------------------------------------------------------------
def reference_forward(x, raw, h0):
    N = raw["gru"][0][0].shape[1]
    x2 = x.reshape(-1, N).astype(jnp.float32)
    h = x2 / jnp.maximum(jnp.abs(x2), 1e-12)
    for (wi, wh, bi, bh), hp in zip(raw["gru"], h0):
        gi = [h @ wi[g] + bi[g] for g in range(3)]
        gh = [hp @ wh[g] + bh[g] for g in range(3)]
        r = jax.nn.sigmoid(gi[0] + gh[0])
        z = jax.nn.sigmoid(gi[1] + gh[1])
        n = jnp.tanh(gi[2] + r * gh[2])
        h = (1.0 - z) * n + z * hp
    for (w, b) in raw["fc"]:
        h = jnp.maximum(h, 0.0) @ w + b
    return h


if __name__ == "__main__":
    N, M, L, K = 8, 32, 2, 4      # inputs, hidden size, GRU layers, output size
    T = 8                         # rows (batch dim after view(-1, 1, N))

    key = jax.random.PRNGKey(0)
    key, kx = jax.random.split(key)
    x = jax.random.normal(kx, (T, N), jnp.float32)

    params = init_params(key, N, M, L, K, T)
    forward = make_forward(N, M, L, K, T)

    out = jax.block_until_ready(forward(x, params["w_slab"], params["aux"]))
    assert out.shape == (T, K), out.shape
    assert bool(jnp.all(jnp.isfinite(out)))

    # Kernel uses bf16 weights/operands (f32 accumulate) -> loose tolerance vs f32 ref.
    ref = reference_forward(x, params["raw"], params["h0"])
    assert bool(jnp.allclose(out, ref, rtol=1e-1, atol=1e-1)), (
        "max abs diff vs reference: %f" % float(jnp.max(jnp.abs(out - ref))))

    print("KERNEL_OK")
</pallas_src>

<mosaic_0001>
module attributes {stable_mosaic.version = 11 : i64} {
  func.func @kernel(%arg0: memref<8x128xf32, #tpu.memory_space<vmem>>, %arg1: memref<1152x128xbf16, #tpu.memory_space<vmem>>, %arg2: memref<48x128xf32, #tpu.memory_space<vmem>>, %arg3: memref<8x128xf32, #tpu.memory_space<vmem>>) attributes {dimension_semantics = [], scalar_prefetch = 0 : i64, scratch_operands = 0 : i64, tpu.core_type = #tpu.core_type<tc>} {
    %c0 = arith.constant 0 : index
    %c0_0 = arith.constant 0 : index
    %0 = vector.load %arg0[%c0, %c0_0] : memref<8x128xf32, #tpu.memory_space<vmem>>, vector<8x128xf32>
    %1 = math.absf %0 : vector<8x128xf32>
    %cst = arith.constant 9.99999996E-13 : f32
    %2 = vector.broadcast %cst : f32 to vector<8x128xf32>
    %3 = arith.maximumf %1, %2 : vector<8x128xf32>
    %4 = arith.divf %0, %3 : vector<8x128xf32>
    %c0_1 = arith.constant 0 : index
    %c0_2 = arith.constant 0 : index
    %5 = vector.load %arg1[%c0_1, %c0_2] : memref<1152x128xbf16, #tpu.memory_space<vmem>>, vector<128x128xbf16>
    %c32 = arith.constant 32 : index
    %c0_3 = arith.constant 0 : index
    %6 = vector.load %arg2[%c32, %c0_3] : memref<48x128xf32, #tpu.memory_space<vmem>>, vector<1x128xf32>
    %c0_4 = arith.constant 0 : index
    %c0_5 = arith.constant 0 : index
    %7 = vector.load %arg2[%c0_4, %c0_5] : memref<48x128xf32, #tpu.memory_space<vmem>>, vector<8x128xf32>
    %c16 = arith.constant 16 : index
    %c0_6 = arith.constant 0 : index
    %8 = vector.load %arg2[%c16, %c0_6] : memref<48x128xf32, #tpu.memory_space<vmem>>, vector<8x128xf32>
    %9 = arith.truncf %4 : vector<8x128xf32> to vector<8x128xbf16>
    %cst_7 = arith.constant dense<0.000000e+00> : vector<8x128xf32>
    %10 = tpu.matmul %9, %5, %cst_7 {dimension_numbers = #tpu.dot_dimension_numbers<[1], [0], [0], [1], [0, 0, 1, 1], [], []>} : vector<8x128xbf16>, vector<128x128xbf16>, vector<8x128xf32> -> vector<8x128xf32>
    %11 = vector.broadcast %6 : vector<1x128xf32> to vector<8x128xf32>
    %12 = arith.addf %10, %11 : vector<8x128xf32>
    %13 = arith.addf %12, %7 : vector<8x128xf32>
    %14 = vector.extract_strided_slice %13 {offsets = [0, 0], sizes = [8, 32], strides = [1, 1]} : vector<8x128xf32> to vector<8x32xf32>
    %15 = arith.negf %14 : vector<8x32xf32>
    %16 = math.exp %15 : vector<8x32xf32>
    %cst_8 = arith.constant 1.000000e+00 : f32
    %17 = vector.broadcast %cst_8 : f32 to vector<8x32xf32>
    %18 = arith.addf %17, %16 : vector<8x32xf32>
    %19 = arith.divf %17, %18 : vector<8x32xf32>
    %20 = vector.extract_strided_slice %13 {offsets = [0, 32], sizes = [8, 32], strides = [1, 1]} : vector<8x128xf32> to vector<8x32xf32>
    %21 = arith.negf %20 : vector<8x32xf32>
    %22 = math.exp %21 : vector<8x32xf32>
    %cst_9 = arith.constant 1.000000e+00 : f32
    %23 = vector.broadcast %cst_9 : f32 to vector<8x32xf32>
    %24 = arith.addf %23, %22 : vector<8x32xf32>
    %25 = arith.divf %23, %24 : vector<8x32xf32>
    %26 = vector.extract_strided_slice %12 {offsets = [0, 64], sizes = [8, 32], strides = [1, 1]} : vector<8x128xf32> to vector<8x32xf32>
    %27 = vector.extract_strided_slice %7 {offsets = [0, 64], sizes = [8, 32], strides = [1, 1]} : vector<8x128xf32> to vector<8x32xf32>
    %28 = arith.mulf %19, %27 : vector<8x32xf32>
    %29 = arith.addf %26, %28 : vector<8x32xf32>
    %30 = math.tanh %29 : vector<8x32xf32>
    %cst_10 = arith.constant 1.000000e+00 : f32
    %31 = vector.broadcast %cst_10 : f32 to vector<8x32xf32>
    %32 = arith.subf %31, %25 : vector<8x32xf32>
    %33 = arith.mulf %32, %30 : vector<8x32xf32>
    %34 = vector.extract_strided_slice %8 {offsets = [0, 0], sizes = [8, 32], strides = [1, 1]} : vector<8x128xf32> to vector<8x32xf32>
    %35 = arith.mulf %25, %34 : vector<8x32xf32>
    %36 = arith.addf %33, %35 : vector<8x32xf32>
    %cst_11 = arith.constant 0.000000e+00 : f32
    %37 = vector.broadcast %cst_11 : f32 to vector<8x96xf32>
    %38 = tpu.concatenate %36, %37 in 1 : vector<8x32xf32>, vector<8x96xf32> -> vector<8x128xf32>
    %c128 = arith.constant 128 : index
    %c0_12 = arith.constant 0 : index
    %39 = vector.load %arg1[%c128, %c0_12] : memref<1152x128xbf16, #tpu.memory_space<vmem>>, vector<128x128xbf16>
    %c33 = arith.constant 33 : index
    %c0_13 = arith.constant 0 : index
    %40 = vector.load %arg2[%c33, %c0_13] : memref<48x128xf32, #tpu.memory_space<vmem>>, vector<1x128xf32>
    %c8 = arith.constant 8 : index
    %c0_14 = arith.constant 0 : index
    %41 = vector.load %arg2[%c8, %c0_14] : memref<48x128xf32, #tpu.memory_space<vmem>>, vector<8x128xf32>
    %c24 = arith.constant 24 : index
    %c0_15 = arith.constant 0 : index
    %42 = vector.load %arg2[%c24, %c0_15] : memref<48x128xf32, #tpu.memory_space<vmem>>, vector<8x128xf32>
    %43 = arith.truncf %38 : vector<8x128xf32> to vector<8x128xbf16>
    %cst_16 = arith.constant dense<0.000000e+00> : vector<8x128xf32>
    %44 = tpu.matmul %43, %39, %cst_16 {dimension_numbers = #tpu.dot_dimension_numbers<[1], [0], [0], [1], [0, 0, 1, 1], [], []>} : vector<8x128xbf16>, vector<128x128xbf16>, vector<8x128xf32> -> vector<8x128xf32>
    %45 = vector.broadcast %40 : vector<1x128xf32> to vector<8x128xf32>
    %46 = arith.addf %44, %45 : vector<8x128xf32>
    %47 = arith.addf %46, %41 : vector<8x128xf32>
    %48 = vector.extract_strided_slice %47 {offsets = [0, 0], sizes = [8, 32], strides = [1, 1]} : vector<8x128xf32> to vector<8x32xf32>
    %49 = arith.negf %48 : vector<8x32xf32>
    %50 = math.exp %49 : vector<8x32xf32>
    %cst_17 = arith.constant 1.000000e+00 : f32
    %51 = vector.broadcast %cst_17 : f32 to vector<8x32xf32>
    %52 = arith.addf %51, %50 : vector<8x32xf32>
    %53 = arith.divf %51, %52 : vector<8x32xf32>
    %54 = vector.extract_strided_slice %47 {offsets = [0, 32], sizes = [8, 32], strides = [1, 1]} : vector<8x128xf32> to vector<8x32xf32>
    %55 = arith.negf %54 : vector<8x32xf32>
    %56 = math.exp %55 : vector<8x32xf32>
    %cst_18 = arith.constant 1.000000e+00 : f32
    %57 = vector.broadcast %cst_18 : f32 to vector<8x32xf32>
    %58 = arith.addf %57, %56 : vector<8x32xf32>
    %59 = arith.divf %57, %58 : vector<8x32xf32>
    %60 = vector.extract_strided_slice %46 {offsets = [0, 64], sizes = [8, 32], strides = [1, 1]} : vector<8x128xf32> to vector<8x32xf32>
    %61 = vector.extract_strided_slice %41 {offsets = [0, 64], sizes = [8, 32], strides = [1, 1]} : vector<8x128xf32> to vector<8x32xf32>
    %62 = arith.mulf %53, %61 : vector<8x32xf32>
    %63 = arith.addf %60, %62 : vector<8x32xf32>
    %64 = math.tanh %63 : vector<8x32xf32>
    %cst_19 = arith.constant 1.000000e+00 : f32
    %65 = vector.broadcast %cst_19 : f32 to vector<8x32xf32>
    %66 = arith.subf %65, %59 : vector<8x32xf32>
    %67 = arith.mulf %66, %64 : vector<8x32xf32>
    %68 = vector.extract_strided_slice %42 {offsets = [0, 0], sizes = [8, 32], strides = [1, 1]} : vector<8x128xf32> to vector<8x32xf32>
    %69 = arith.mulf %59, %68 : vector<8x32xf32>
    %70 = arith.addf %67, %69 : vector<8x32xf32>
    %cst_20 = arith.constant 0.000000e+00 : f32
    %71 = vector.broadcast %cst_20 : f32 to vector<8x96xf32>
    %72 = tpu.concatenate %70, %71 in 1 : vector<8x32xf32>, vector<8x96xf32> -> vector<8x128xf32>
    %c256 = arith.constant 256 : index
    %c0_21 = arith.constant 0 : index
    %73 = vector.load %arg1[%c256, %c0_21] : memref<1152x128xbf16, #tpu.memory_space<vmem>>, vector<128x128xbf16>
    %c34 = arith.constant 34 : index
    %c0_22 = arith.constant 0 : index
    %74 = vector.load %arg2[%c34, %c0_22] : memref<48x128xf32, #tpu.memory_space<vmem>>, vector<1x128xf32>
    %cst_23 = arith.constant 0.000000e+00 : f32
    %75 = vector.broadcast %cst_23 : f32 to vector<8x128xf32>
    %76 = arith.maximumf %72, %75 : vector<8x128xf32>
    %77 = arith.truncf %76 : vector<8x128xf32> to vector<8x128xbf16>
    %cst_24 = arith.constant dense<0.000000e+00> : vector<8x128xf32>
    %78 = tpu.matmul %77, %73, %cst_24 {dimension_numbers = #tpu.dot_dimension_numbers<[1], [0], [0], [1], [0, 0, 1, 1], [], []>} : vector<8x128xbf16>, vector<128x128xbf16>, vector<8x128xf32> -> vector<8x128xf32>
    %79 = vector.broadcast %74 : vector<1x128xf32> to vector<8x128xf32>
    %80 = arith.addf %78, %79 : vector<8x128xf32>
    %c384 = arith.constant 384 : index
    %c0_25 = arith.constant 0 : index
    %81 = vector.load %arg1[%c384, %c0_25] : memref<1152x128xbf16, #tpu.memory_space<vmem>>, vector<128x128xbf16>
    %c35 = arith.constant 35 : index
    %c0_26 = arith.constant 0 : index
    %82 = vector.load %arg2[%c35, %c0_26] : memref<48x128xf32, #tpu.memory_space<vmem>>, vector<1x128xf32>
    %cst_27 = arith.constant 0.000000e+00 : f32
    %83 = vector.broadcast %cst_27 : f32 to vector<8x128xf32>
    %84 = arith.maximumf %80, %83 : vector<8x128xf32>
    %85 = arith.truncf %84 : vector<8x128xf32> to vector<8x128xbf16>
    %cst_28 = arith.constant dense<0.000000e+00> : vector<8x128xf32>
    %86 = tpu.matmul %85, %81, %cst_28 {dimension_numbers = #tpu.dot_dimension_numbers<[1], [0], [0], [1], [0, 0, 1, 1], [], []>} : vector<8x128xbf16>, vector<128x128xbf16>, vector<8x128xf32> -> vector<8x128xf32>
    %87 = vector.broadcast %82 : vector<1x128xf32> to vector<8x128xf32>
    %88 = arith.addf %86, %87 : vector<8x128xf32>
    %c512 = arith.constant 512 : index
    %c0_29 = arith.constant 0 : index
    %89 = vector.load %arg1[%c512, %c0_29] : memref<1152x128xbf16, #tpu.memory_space<vmem>>, vector<128x128xbf16>
    %c36 = arith.constant 36 : index
    %c0_30 = arith.constant 0 : index
    %90 = vector.load %arg2[%c36, %c0_30] : memref<48x128xf32, #tpu.memory_space<vmem>>, vector<1x128xf32>
    %cst_31 = arith.constant 0.000000e+00 : f32
    %91 = vector.broadcast %cst_31 : f32 to vector<8x128xf32>
    %92 = arith.maximumf %88, %91 : vector<8x128xf32>
    %93 = arith.truncf %92 : vector<8x128xf32> to vector<8x128xbf16>
    %cst_32 = arith.constant dense<0.000000e+00> : vector<8x128xf32>
    %94 = tpu.matmul %93, %89, %cst_32 {dimension_numbers = #tpu.dot_dimension_numbers<[1], [0], [0], [1], [0, 0, 1, 1], [], []>} : vector<8x128xbf16>, vector<128x128xbf16>, vector<8x128xf32> -> vector<8x128xf32>
    %95 = vector.broadcast %90 : vector<1x128xf32> to vector<8x128xf32>
    %96 = arith.addf %94, %95 : vector<8x128xf32>
    %c640 = arith.constant 640 : index
    %c0_33 = arith.constant 0 : index
    %97 = vector.load %arg1[%c640, %c0_33] : memref<1152x128xbf16, #tpu.memory_space<vmem>>, vector<128x128xbf16>
    %c37 = arith.constant 37 : index
    %c0_34 = arith.constant 0 : index
    %98 = vector.load %arg2[%c37, %c0_34] : memref<48x128xf32, #tpu.memory_space<vmem>>, vector<1x128xf32>
    %cst_35 = arith.constant 0.000000e+00 : f32
    %99 = vector.broadcast %cst_35 : f32 to vector<8x128xf32>
    %100 = arith.maximumf %96, %99 : vector<8x128xf32>
    %101 = arith.truncf %100 : vector<8x128xf32> to vector<8x128xbf16>
    %cst_36 = arith.constant dense<0.000000e+00> : vector<8x128xf32>
    %102 = tpu.matmul %101, %97, %cst_36 {dimension_numbers = #tpu.dot_dimension_numbers<[1], [0], [0], [1], [0, 0, 1, 1], [], []>} : vector<8x128xbf16>, vector<128x128xbf16>, vector<8x128xf32> -> vector<8x128xf32>
    %103 = vector.broadcast %98 : vector<1x128xf32> to vector<8x128xf32>
    %104 = arith.addf %102, %103 : vector<8x128xf32>
    %c768 = arith.constant 768 : index
    %c0_37 = arith.constant 0 : index
    %105 = vector.load %arg1[%c768, %c0_37] : memref<1152x128xbf16, #tpu.memory_space<vmem>>, vector<128x128xbf16>
    %c38 = arith.constant 38 : index
    %c0_38 = arith.constant 0 : index
    %106 = vector.load %arg2[%c38, %c0_38] : memref<48x128xf32, #tpu.memory_space<vmem>>, vector<1x128xf32>
    %cst_39 = arith.constant 0.000000e+00 : f32
    %107 = vector.broadcast %cst_39 : f32 to vector<8x128xf32>
    %108 = arith.maximumf %104, %107 : vector<8x128xf32>
    %109 = arith.truncf %108 : vector<8x128xf32> to vector<8x128xbf16>
    %cst_40 = arith.constant dense<0.000000e+00> : vector<8x128xf32>
    %110 = tpu.matmul %109, %105, %cst_40 {dimension_numbers = #tpu.dot_dimension_numbers<[1], [0], [0], [1], [0, 0, 1, 1], [], []>} : vector<8x128xbf16>, vector<128x128xbf16>, vector<8x128xf32> -> vector<8x128xf32>
    %111 = vector.broadcast %106 : vector<1x128xf32> to vector<8x128xf32>
    %112 = arith.addf %110, %111 : vector<8x128xf32>
    %c896 = arith.constant 896 : index
    %c0_41 = arith.constant 0 : index
    %113 = vector.load %arg1[%c896, %c0_41] : memref<1152x128xbf16, #tpu.memory_space<vmem>>, vector<128x128xbf16>
    %c39 = arith.constant 39 : index
    %c0_42 = arith.constant 0 : index
    %114 = vector.load %arg2[%c39, %c0_42] : memref<48x128xf32, #tpu.memory_space<vmem>>, vector<1x128xf32>
    %cst_43 = arith.constant 0.000000e+00 : f32
    %115 = vector.broadcast %cst_43 : f32 to vector<8x128xf32>
    %116 = arith.maximumf %112, %115 : vector<8x128xf32>
    %117 = arith.truncf %116 : vector<8x128xf32> to vector<8x128xbf16>
    %cst_44 = arith.constant dense<0.000000e+00> : vector<8x128xf32>
    %118 = tpu.matmul %117, %113, %cst_44 {dimension_numbers = #tpu.dot_dimension_numbers<[1], [0], [0], [1], [0, 0, 1, 1], [], []>} : vector<8x128xbf16>, vector<128x128xbf16>, vector<8x128xf32> -> vector<8x128xf32>
    %119 = vector.broadcast %114 : vector<1x128xf32> to vector<8x128xf32>
    %120 = arith.addf %118, %119 : vector<8x128xf32>
    %c1024 = arith.constant 1024 : index
    %c0_45 = arith.constant 0 : index
    %121 = vector.load %arg1[%c1024, %c0_45] : memref<1152x128xbf16, #tpu.memory_space<vmem>>, vector<128x128xbf16>
    %c40 = arith.constant 40 : index
    %c0_46 = arith.constant 0 : index
    %122 = vector.load %arg2[%c40, %c0_46] : memref<48x128xf32, #tpu.memory_space<vmem>>, vector<1x128xf32>
    %cst_47 = arith.constant 0.000000e+00 : f32
    %123 = vector.broadcast %cst_47 : f32 to vector<8x128xf32>
    %124 = arith.maximumf %120, %123 : vector<8x128xf32>
    %125 = arith.truncf %124 : vector<8x128xf32> to vector<8x128xbf16>
    %cst_48 = arith.constant dense<0.000000e+00> : vector<8x128xf32>
    %126 = tpu.matmul %125, %121, %cst_48 {dimension_numbers = #tpu.dot_dimension_numbers<[1], [0], [0], [1], [0, 0, 1, 1], [], []>} : vector<8x128xbf16>, vector<128x128xbf16>, vector<8x128xf32> -> vector<8x128xf32>
    %127 = vector.broadcast %122 : vector<1x128xf32> to vector<8x128xf32>
    %128 = arith.addf %126, %127 : vector<8x128xf32>
    %c0_49 = arith.constant 0 : index
    %c0_50 = arith.constant 0 : index
    %129 = vector.load %arg3[%c0_49, %c0_50] : memref<8x128xf32, #tpu.memory_space<vmem>>, vector<8x128xf32>
    tpu.vector_store %arg3[%c0_49, %c0_50], %128 {strides = array<i32>} : memref<8x128xf32, #tpu.memory_space<vmem>>, vector<8x128xf32>,
    return
  }
}

</mosaic_0001>

<bundles_post_ra>
// kernel: forward.1
= control target key start
LH: loop header
LB: loop body
LE: loop exit
PB: predicated region body
PF: predicated region fallthrough
CT: control target
= control target key end

     0   :  { %8 = vsyncpa [#allocation3], 0  ;;  %s1783_s0 = inlined_call_operand.vmem [shape: f32[8,128], index: 0, kind: input, shape index: {}]   ;;  %s1784_s1 = inlined_call_operand.hbm [shape: bf16[1152,128], index: 1, kind: input, shape index: {}]   ;;  %s1785_s2 = inlined_call_operand.hbm [shape: f32[48,128], index: 2, kind: input, shape index: {}]   ;;  %s1786_s3 = inlined_call_operand.vmem [shape: f32[8,128], index: 3, kind: output, shape index: {}]  }
   0x1   :  { %9 = vsyncpa [#allocation5], 0  ;;  %s1618_s12 = smov [#allocation2]   ;;  %s1570_s16 = scalar_lea.hbm %s1784_s1, 9216 }
   0x2   :  { %s17_s13 = sshll.u32 %s1618_s12, 4  ;;  %p1571_p0 = scmp.ne.s32.totalorder %s1784_s1, %s1570_s16  ;;  %s18_s13 = int_to_ptr.vmem [resolvable:$true] %s17_s13 }
   0x3   :  { %p1574_p1 = scmp.lt.u32.totalorder %s1570_s16, %s1784_s1 }
   0x5   :  { %p1576_p2 = pnand %p1574_p1, %p1571_p0 }
   0x7   :  { %1579 = shalt.err (!%p1576_p2)
}
   0x8   :  { %s1580_s21 = scalar_lea.vmem %s18_s13, 9216  ;;  %p1585_p4 = scmp.lt.s32.totalorder %s18_s13, %s18_s13 }
   0x9   :  { %p1581_p3 = scmp.ne.s32.totalorder %s18_s13, %s1580_s21  ;;  %p1586_p5 = scmp.lt.s32.totalorder %s1580_s21, %s1580_s21 }
   0xb   :  { %p1587_p6 = por %p1586_p5, %p1585_p4 }
   0xd   :  { %p1588_p7 = pnand %p1587_p6, %p1581_p3 }
   0xf   :  { %1591 = shalt.err (!%p1588_p7)
}
  0x10   :  { %s1619_s22 = smov 64   ;;  %s1620_s23 = smov 4  }
  0x11   :  { %23 = dma.hbm_to_vmem [thread:$0]  %s1784_s1, 9216, %s18_s13, [#allocation3], %s1619_s22, %s1619_s22, %s1620_s23  }
  0x12   :  { %s1621_s26 = smov [#allocation4]   ;;  %s1592_s30 = scalar_lea.hbm %s1785_s2, 768 }
  0x13   :  { %s29_s27 = sshll.u32 %s1621_s26, 4  ;;  %p1593_p8 = scmp.ne.s32.totalorder %s1785_s2, %s1592_s30  ;;  %s30_s27 = int_to_ptr.vmem [resolvable:$true] %s29_s27 }
  0x14   :  { %p1596_p9 = scmp.lt.u32.totalorder %s1592_s30, %s1785_s2 }
  0x16   :  { %p1598_p10 = pnand %p1596_p9, %p1593_p8 }
  0x18   :  { %1601 = shalt.err (!%p1598_p10)
}
  0x19   :  { %s1602_s8 = scalar_lea.vmem %s30_s27, 768  ;;  %p1607_p12 = scmp.lt.s32.totalorder %s30_s27, %s30_s27 }
  0x1a   :  { %p1603_p11 = scmp.ne.s32.totalorder %s30_s27, %s1602_s8  ;;  %p1608_p13 = scmp.lt.s32.totalorder %s1602_s8, %s1602_s8 }
  0x1c   :  { %p1609_p0 = por %p1608_p13, %p1607_p12 }
  0x1e   :  { %p1610_p1 = pnand %p1609_p0, %p1603_p11 }
  0x20   :  { %1613 = shalt.err (!%p1610_p1)
}
  0x21   :  { %s1622_s1 = smov 128   ;;  %s1623_s9 = smov 8  }
  0x22   :  { %35 = dma.hbm_to_vmem [thread:$0]  %s1785_s2, 768, %s30_s27, [#allocation5], %s1622_s1, %s1622_s1, %s1623_s9  }
  0x23   :  { %1614 = dma.done.wait [#allocation3], 9216  }
  0x24   :  { %1615 = vsyncadd [#allocation3], 4294958080 }
  0x25   :  { %1616 = dma.done.wait [#allocation5], 768  }
  0x26   :  { %1617 = vsyncadd [#allocation5], 4294966528  ;;  %v1624_v0 = vmov 0.0   ;;  %vm1625_vm0 = vmmov 0   ;;  %v1484_v1 = vld [vmem:[#allocation2] sm:$0xff]   ;;  %v1485_v2 = vld [vmem:[#allocation2 + $0x8] sm:$0xff]  }
  0x27   :  { %1294 = vmatprep.subr.bf16.mxu0 %v1624_v0  ;;  %1310 = vmatprep.mubr.msk.bf16.mxu0 %vm1625_vm0, %v1624_v0  ;;  %v1486_v3 = vld [vmem:[#allocation2 + $0x10] sm:$0xff]   ;;  %v1487_v4 = vld [vmem:[#allocation2 + $0x18] sm:$0xff]   ;;  %v43_v5 = vld [vmem:[%s1783_s0] sm:$0xff]  ;;  %s1626_s0 = smov 96   ;;  %s1627_s13 = smov 32   ;;  %vm194_vm1 = vcmask 261120  }
  0x28   :  { %1314 = vmatprep.subr.bf16.mxu1 %v1624_v0  ;;  %1330 = vmatprep.mubr.msk.bf16.mxu1 %vm1625_vm0, %v1624_v0  ;;  %v65_v6 = vld [vmem:[#allocation4] sm:$0xff]  ;;  %v44_v7 = vand.u32 2147483647, %v43_v5  ;;  %v1489_v10 = vld [vmem:[#allocation2 + $0x28] sm:$0xff]   ;;  %v1490_v11 = vld [vmem:[#allocation2 + $0x30] sm:$0xff]  }
  0x29   :  { %1295 = vmatpush3.bf16.msra.mxu0 %v1484_v1  ;;  %168 = vrot.lane.b32.xlu0 %v65_v6, %s1619_s22  ;;  %v1488_v9 = vld [vmem:[#allocation2 + $0x20] sm:$0xff]   ;;  %v1491_v13 = vld [vmem:[#allocation2 + $0x38] sm:$0xff]   ;;  %v1493_v32 = vld [vmem:[#allocation2 + $0x48] sm:$0xff]  }
  0x2a   :  { %1296 = vmatprep.subr.bf16.mxu0 %v1624_v0  ;;  %v45_v8 = vmax.f32 %v44_v7, 1e-12  ;;  %v1127_v16 = vld [vmem:[#allocation4 + $0x20] ss:$0 sm:$0xff]  ;;  %v66_v34 = vld [vmem:[#allocation4 + $0x10] sm:$0xff]  ;;  %v1495_v36 = vld [vmem:[#allocation2 + $0x58] sm:$0xff]  }
  0x2b   :  { %v1492_v31 = vld [vmem:[#allocation2 + $0x40] sm:$0xff]   ;;  %v1494_v35 = vld [vmem:[#allocation2 + $0x50] sm:$0xff]   ;;  %v1497_v38 = vld [vmem:[#allocation2 + $0x68] sm:$0xff]  }
  0x2c   :  { %1556 = vrcp.f32 %v45_v8  ;;  %1315 = vmatpush3.bf16.msra.mxu1 %v1492_v31  ;;  %v1496_v37 = vld [vmem:[#allocation2 + $0x60] sm:$0xff]   ;;  %v1498_v39 = vld [vmem:[#allocation2 + $0x70] sm:$0xff]   ;;  %v1499_v40 = vld [vmem:[#allocation2 + $0x78] sm:$0xff]  }
  0x2d   :  { %1297 = vmatpush3.bf16.msra.mxu0 %v1485_v2  ;;  %1316 = vmatprep.subr.bf16.mxu1 %v1624_v0  ;;  %v213_v41 = vld [vmem:[#allocation4 + $0x8] sm:$0xff]  ;;  %vm1146_vm2 = vmpackc.low %vm194_vm1, %vm194_vm1  ;;  %v1137_v50 = vld [vmem:[#allocation4 + $0x21] ss:$0 sm:$0xff] }
  0x2e   :  { %1298 = vmatprep.subr.bf16.mxu0 %v1624_v0  ;;  %v214_v63 = vld [vmem:[#allocation4 + $0x18] sm:$0xff]  ;;  %v1504_v8 = vld [vmem:[#allocation2 + $0xa0] sm:$0xff]   ;;  %v1517_v31 = vld [vmem:[#allocation2 + $0x108] sm:$0xff]  }
  0x2f   :  { %v1503_v7 = vld [vmem:[#allocation2 + $0x98] sm:$0xff]  }
  0x30   :  { %1317 = vmatpush3.bf16.msra.mxu1 %v1493_v32  ;;  %v1518_v32 = vld [vmem:[#allocation2 + $0x110] sm:$0xff]  }
  0x31   :  { %1299 = vmatpush3.bf16.msra.mxu0 %v1486_v3  ;;  %1318 = vmatprep.subr.bf16.mxu1 %v1624_v0  ;;  %v1500_v3 = vld [vmem:[#allocation2 + $0x80] sm:$0xff]  }
  0x32   :  { %1300 = vmatprep.subr.bf16.mxu0 %v1624_v0 }
  0x34   :  { %1319 = vmatpush3.bf16.msra.mxu1 %v1494_v35  ;;  %v1521_v35 = vld [vmem:[#allocation2 + $0x128] sm:$0xff]  }
  0x35   :  { %1301 = vmatpush3.bf16.msra.mxu0 %v1487_v4  ;;  %1320 = vmatprep.subr.bf16.mxu1 %v1624_v0  ;;  %v1501_v4 = vld [vmem:[#allocation2 + $0x88] sm:$0xff]  }
  0x36   :  { %1302 = vmatprep.subr.bf16.mxu0 %v1624_v0  ;;  %v1557_v12 = vpop.eup %1556 }
  0x37   :  { %v47_v14 = vmul.f32 %v1557_v12, %v43_v5  ;;  %v1502_v5 = vld [vmem:[#allocation2 + $0x90] sm:$0xff]   ;;  %v1508_v12 = vld [vmem:[#allocation2 + $0xc0] sm:$0xff]  }
  0x38   :  { %1321 = vmatpush3.bf16.msra.mxu1 %v1495_v36  ;;  %v1150_v36 = vld [vmem:[#allocation4 + $0x22] ss:$0 sm:$0xff] }
  0x39   :  { %1303 = vmatpush3.bf16.msra.mxu0 %v1488_v9  ;;  %v67_v15 = vpack.c.bf16 %v47_v14, %v47_v14  ;;  %1322 = vmatprep.subr.bf16.mxu1 %v1624_v0  ;;  %v1505_v9 = vld [vmem:[#allocation2 + $0xa8] sm:$0xff]  }
  0x3a   :  { %1304 = vmatprep.subr.bf16.mxu0 %v1624_v0 }
  0x3c   :  { %1323 = vmatpush3.bf16.msra.mxu1 %v1496_v37 }
  0x3d   :  { %1305 = vmatpush3.bf16.msra.mxu0 %v1489_v10  ;;  %1324 = vmatprep.subr.bf16.mxu1 %v1624_v0  ;;  %v1506_v10 = vld [vmem:[#allocation2 + $0xb0] sm:$0xff]  }
  0x3e   :  { %1306 = vmatprep.subr.bf16.mxu0 %v1624_v0 }
  0x40   :  { %1325 = vmatpush3.bf16.msra.mxu1 %v1497_v38 }
  0x41   :  { %1307 = vmatpush3.bf16.msra.mxu0 %v1490_v11  ;;  %1326 = vmatprep.subr.bf16.mxu1 %v1624_v0  ;;  %v1507_v11 = vld [vmem:[#allocation2 + $0xb8] sm:$0xff]  }
  0x42   :  { %1308 = vmatprep.subr.bf16.mxu0 %v1624_v0 }
  0x44   :  { %1327 = vmatpush3.bf16.msra.mxu1 %v1498_v39 }
  0x45   :  { %1309 = vmatpush3.bf16.msra.mxu0 %v1491_v13  ;;  %1328 = vmatprep.subr.bf16.mxu1 %v1624_v0 }
  0x46   :  { %1334 = vmatprep.subr.bf16.mxu0 %v1624_v0 }
  0x48   :  { %1311 = vmatmul.mubr.bf16.vlgmr.msra.gmra.mrb[0].mxu0 %v67_v15  ;;  %1329 = vmatpush3.bf16.msra.mxu1 %v1499_v40  ;;  %v1509_v15 = vld [vmem:[#allocation2 + $0xc8] sm:$0xff]  }
  0x49   :  { %1350 = vmatprep.mubr.msk.bf16.mxu0 %vm1625_vm0, %v1624_v0  ;;  %1354 = vmatprep.subr.bf16.mxu1 %v1624_v0 }
  0x4a   :  { %1335 = vmatpush3.bf16.msra.mxu0 %v1500_v3  ;;  %v1536_v3 = vld [vmem:[#allocation2 + $0x1a0] sm:$0xff]  }
  0x4b   :  { %1336 = vmatprep.subr.bf16.mxu0 %v1624_v0 }
  0x4e   :  { %1337 = vmatpush3.bf16.msra.mxu0 %v1501_v4  ;;  %v1537_v4 = vld [vmem:[#allocation2 + $0x1a8] sm:$0xff]  }
  0x4f   :  { %1338 = vmatprep.subr.bf16.mxu0 %v1624_v0 }
  0x52   :  { %1339 = vmatpush3.bf16.msra.mxu0 %v1502_v5  ;;  %v1168_v5 = vld [vmem:[#allocation4 + $0x24] ss:$0 sm:$0xff] }
  0x53   :  { %1340 = vmatprep.subr.bf16.mxu0 %v1624_v0 }
  0x56   :  { %1341 = vmatpush3.bf16.msra.mxu0 %v1503_v7 }
  0x57   :  { %1342 = vmatprep.subr.bf16.mxu0 %v1624_v0 }
  0x5a   :  { %1343 = vmatpush3.bf16.msra.mxu0 %v1504_v8 }
  0x5b   :  { %1344 = vmatprep.subr.bf16.mxu0 %v1624_v0 }
  0x5e   :  { %1345 = vmatpush3.bf16.msra.mxu0 %v1505_v9 }
  0x5f   :  { %1346 = vmatprep.subr.bf16.mxu0 %v1624_v0 }
  0x62   :  { %1347 = vmatpush3.bf16.msra.mxu0 %v1506_v10 }
  0x63   :  { %1348 = vmatprep.subr.bf16.mxu0 %v1624_v0 }
  0x66   :  { %1349 = vmatpush3.bf16.msra.mxu0 %v1507_v11 }
  0x67   :  { %1374 = vmatprep.subr.bf16.mxu0 %v1624_v0 }
  0x9b   :  { %v169_v26 = vpop.permute.xlu0 %168 }
 0x11b   :  { %v154_v17 = vpop.f32.mrb[0].mxu0 }
 0x11c   :  { %v155_v18 = vadd.f32 %v1127_v16, %v154_v17  ;;  %v1312_v19 = vpop.f32.mrb[1].mxu0 }
 0x11d   :  { %v157_v20 = vpop.f32.mrb[2].mxu0 }
 0x11e   :  { %v160_v21 = vadd.f32 %v155_v18, %v65_v6  ;;  %v1313_v22 = vpop.f32.mrb[3].mxu0  ;;  %v1510_v20 = vld [vmem:[#allocation2 + $0xd0] sm:$0xff]  }
 0x11f   :  { %v1512_v22 = vld [vmem:[#allocation2 + $0xe0] sm:$0xff]  }
 0x120   :  { %v1136_v23 = vmul.f32 -1.442695, %v160_v21  ;;  %v1511_v21 = vld [vmem:[#allocation2 + $0xd8] sm:$0xff]  }
 0x122   :  { %1558 = vpow2.f32 %v1136_v23  ;;  %v1513_v23 = vld [vmem:[#allocation2 + $0xe8] sm:$0xff]  }
 0x12c   :  { %v1559_v24 = vpop.eup %1558 }
 0x12d   :  { %v164_v25 = vadd.f32 1.0, %v1559_v24 }
 0x12f   :  { %1560 = vrcp.f32 %v164_v25 }
 0x139   :  { %v1561_v27 = vpop.eup %1560 }
 0x13a   :  { %v171_v28 = vmul.f32 %v1561_v27, %v169_v26  ;;  %v178_v43 = vsub.f32 1.0, %v1561_v27 }
 0x13c   :  { %173 = vrot.lane.b32.xlu0 %v171_v28, %s1619_s22  ;;  %v1514_v28 = vld [vmem:[#allocation2 + $0xf0] sm:$0xff]  }
 0x1ae   :  { %v174_v29 = vpop.permute.xlu0 %173 }
 0x1af   :  { %v176_v30 = vadd.f32 %v174_v29, %v155_v18  ;;  %v1515_v29 = vld [vmem:[#allocation2 + $0xf8] sm:$0xff]  }
 0x1b1   :  { %1562 = vtanh.f32 %v176_v30  ;;  %v1516_v30 = vld [vmem:[#allocation2 + $0x100] sm:$0xff]  }
 0x1bb   :  { %v1563_v33 = vpop.eup %1562 }
 0x1bc   :  { %180 = vrot.lane.b32.xlu1 %v1563_v33, %s1626_s0  ;;  %v1519_v33 = vld [vmem:[#allocation2 + $0x118] sm:$0xff]  }
 0x1c0   :  { %185 = vrot.lane.b32.xlu1 %v66_v34, %s1627_s13  ;;  %v1520_v34 = vld [vmem:[#allocation2 + $0x120] sm:$0xff]  }
 0x1c4   :  { %316 = vrot.lane.b32.xlu1 %v213_v41, %s1619_s22 }
 0x22e   :  { %v181_v42 = vpop.permute.xlu1 %180 }
 0x22f   :  { %v183_v45 = vmul.f32 %v181_v42, %v178_v43 }
 0x232   :  { %v186_v44 = vpop.permute.xlu1 %185 }
 0x233   :  { %v188_v46 = vmul.f32 %v1561_v27, %v186_v44  ;;  %v1522_v44 = vld [vmem:[#allocation2 + $0x130] sm:$0xff]  }
 0x235   :  { %v189_v47 = vadd.f32 %v188_v46, %v183_v45  ;;  %v1523_v45 = vld [vmem:[#allocation2 + $0x138] sm:$0xff]   ;;  %v1524_v46 = vld [vmem:[#allocation2 + $0x140] sm:$0xff]  }
 0x236   :  { %v317_v60 = vpop.permute.xlu1 %316 }
 0x237   :  { %191 = vrot.lane.b32.xlu0 %v189_v47, %s1626_s0  ;;  %v1525_v47 = vld [vmem:[#allocation2 + $0x148] sm:$0xff]  }
 0x2a9   :  { %v192_v48 = vpop.permute.xlu0 %191 }
 0x2aa   :  { %v1147_v49 = vpack.c.bf16 %v192_v48, %v192_v48  ;;  %v1526_v48 = vld [vmem:[#allocation2 + $0x150] sm:$0xff]  }
 0x2ac   :  { %1331 = vmatmul.mubr.msk.bf16.vlgmr.msra.gmra.mrb[0].mxu1 %vm1146_vm2, %v1147_v49  ;;  %v1527_v49 = vld [vmem:[#allocation2 + $0x158] sm:$0xff]  }
 0x2ad   :  { %1370 = vmatprep.mubr.msk.bf16.mxu1 %vm1625_vm0, %v1624_v0  ;;  %1355 = vmatpush3.bf16.msra.mxu1 %v1508_v12 }
 0x2ae   :  { %1356 = vmatprep.subr.bf16.mxu1 %v1624_v0 }
 0x2b1   :  { %1357 = vmatpush3.bf16.msra.mxu1 %v1509_v15  ;;  %v1540_v15 = vld [vmem:[#allocation2 + $0x1c0] sm:$0xff]  }
 0x2b2   :  { %1358 = vmatprep.subr.bf16.mxu1 %v1624_v0 }
 0x2b5   :  { %1359 = vmatpush3.bf16.msra.mxu1 %v1510_v20  ;;  %v1545_v20 = vld [vmem:[#allocation2 + $0x1e8] sm:$0xff]  }
 0x2b6   :  { %1360 = vmatprep.subr.bf16.mxu1 %v1624_v0 }
 0x2b9   :  { %1361 = vmatpush3.bf16.msra.mxu1 %v1511_v21  ;;  %v1177_v21 = vld [vmem:[#allocation4 + $0x25] ss:$0 sm:$0xff] }
 0x2ba   :  { %1362 = vmatprep.subr.bf16.mxu1 %v1624_v0 }
 0x2bd   :  { %1363 = vmatpush3.bf16.msra.mxu1 %v1512_v22 }
 0x2be   :  { %1364 = vmatprep.subr.bf16.mxu1 %v1624_v0 }
 0x2c1   :  { %1365 = vmatpush3.bf16.msra.mxu1 %v1513_v23 }
 0x2c2   :  { %1366 = vmatprep.subr.bf16.mxu1 %v1624_v0 }
 0x2c5   :  { %1367 = vmatpush3.bf16.msra.mxu1 %v1514_v28 }
 0x2c6   :  { %1368 = vmatprep.subr.bf16.mxu1 %v1624_v0 }
 0x2c9   :  { %1369 = vmatpush3.bf16.msra.mxu1 %v1515_v29  ;;  %v1546_v29 = vld [vmem:[#allocation2 + $0x1f0] sm:$0xff]  }
 0x2ca   :  { %1394 = vmatprep.subr.bf16.mxu1 %v1624_v0 }
 0x37f   :  { %v302_v51 = vpop.f32.mrb[0].mxu1 }
 0x380   :  { %v303_v52 = vadd.f32 %v1137_v50, %v302_v51  ;;  %v1332_v53 = vpop.f32.mrb[1].mxu1  ;;  %v1528_v50 = vld [vmem:[#allocation2 + $0x160] sm:$0xff]   ;;  %v1529_v51 = vld [vmem:[#allocation2 + $0x168] sm:$0xff]  }
 0x381   :  { %v305_v54 = vpop.f32.mrb[2].mxu1 }
 0x382   :  { %v308_v55 = vadd.f32 %v303_v52, %v213_v41  ;;  %v1333_v56 = vpop.f32.mrb[3].mxu1 }
 0x384   :  { %v1149_v57 = vmul.f32 -1.442695, %v308_v55 }
 0x386   :  { %1564 = vpow2.f32 %v1149_v57 }
 0x390   :  { %v1565_v58 = vpop.eup %1564 }
 0x391   :  { %v312_v59 = vadd.f32 1.0, %v1565_v58 }
 0x393   :  { %1566 = vrcp.f32 %v312_v59 }
 0x39d   :  { %v1567_v61 = vpop.eup %1566 }
 0x39e   :  { %v319_v62 = vmul.f32 %v1567_v61, %v317_v60  ;;  %v326_v14 = vsub.f32 1.0, %v1567_v61  ;;  %v1530_v60 = vld [vmem:[#allocation2 + $0x170] sm:$0xff]  }
 0x3a0   :  { %321 = vrot.lane.b32.xlu0 %v319_v62, %s1619_s22  ;;  %v1532_v62 = vld [vmem:[#allocation2 + $0x180] sm:$0xff]  }
 0x3a4   :  { %333 = vrot.lane.b32.xlu0 %v214_v63, %s1627_s13  ;;  %v1533_v63 = vld [vmem:[#allocation2 + $0x188] sm:$0xff]  }
 0x412   :  { %v322_v1 = vpop.permute.xlu0 %321 }
 0x413   :  { %v324_v2 = vadd.f32 %v322_v1, %v303_v52  ;;  %v1159_v52 = vld [vmem:[#allocation4 + $0x23] ss:$0 sm:$0xff]  ;;  %v1534_v1 = vld [vmem:[#allocation2 + $0x190] sm:$0xff]  }
 0x415   :  { %1568 = vtanh.f32 %v324_v2  ;;  %v1535_v2 = vld [vmem:[#allocation2 + $0x198] sm:$0xff]  }
 0x416   :  { %v334_v13 = vpop.permute.xlu0 %333 }
 0x417   :  { %v336_v17 = vmul.f32 %v1567_v61, %v334_v13  ;;  %v1531_v61 = vld [vmem:[#allocation2 + $0x178] sm:$0xff]   ;;  %v1538_v13 = vld [vmem:[#allocation2 + $0x1b0] sm:$0xff]  }
 0x41f   :  { %v1569_v6 = vpop.eup %1568 }
 0x420   :  { %328 = vrot.lane.b32.xlu1 %v1569_v6, %s1626_s0 }
 0x492   :  { %v329_v16 = vpop.permute.xlu1 %328 }
 0x493   :  { %v331_v18 = vmul.f32 %v329_v16, %v326_v14  ;;  %v1539_v14 = vld [vmem:[#allocation2 + $0x1b8] sm:$0xff]   ;;  %v1541_v16 = vld [vmem:[#allocation2 + $0x1c8] sm:$0xff]  }
 0x495   :  { %v337_v19 = vadd.f32 %v336_v17, %v331_v18  ;;  %v1542_v17 = vld [vmem:[#allocation2 + $0x1d0] sm:$0xff]   ;;  %v1543_v18 = vld [vmem:[#allocation2 + $0x1d8] sm:$0xff]  }
 0x497   :  { %339 = vrot.lane.b32.xlu1 %v337_v19, %s1626_s0  ;;  %v1544_v19 = vld [vmem:[#allocation2 + $0x1e0] sm:$0xff]  }
 0x509   :  { %v340_v24 = vpop.permute.xlu1 %339 }
 0x50a   :  { %v342_v25 = vsel %vm194_vm1, %v340_v24, 0.0 }
 0x50b   :  { %v360_v26 = vmax.f32 %v342_v25, 0.0 }
 0x50d   :  { %v361_v27 = vpack.c.bf16 %v360_v26, %v360_v26 }
 0x50f   :  { %1351 = vmatmul.mubr.bf16.vlgmr.msra.gmra.mrb[4].mxu0 %v361_v27 }
 0x510   :  { %1390 = vmatprep.mubr.msk.bf16.mxu0 %vm1625_vm0, %v1624_v0  ;;  %1375 = vmatpush3.bf16.msra.mxu0 %v1516_v30  ;;  %v1547_v30 = vld [vmem:[#allocation2 + $0x1f8] sm:$0xff]  }
 0x511   :  { %1376 = vmatprep.subr.bf16.mxu0 %v1624_v0 }
 0x514   :  { %1377 = vmatpush3.bf16.msra.mxu0 %v1517_v31  ;;  %v1548_v31 = vld [vmem:[#allocation2 + $0x200] sm:$0xff]  }
 0x515   :  { %1378 = vmatprep.subr.bf16.mxu0 %v1624_v0 }
 0x518   :  { %1379 = vmatpush3.bf16.msra.mxu0 %v1518_v32  ;;  %v1549_v32 = vld [vmem:[#allocation2 + $0x208] sm:$0xff]  }
 0x519   :  { %1380 = vmatprep.subr.bf16.mxu0 %v1624_v0 }
 0x51c   :  { %1381 = vmatpush3.bf16.msra.mxu0 %v1519_v33  ;;  %v1550_v33 = vld [vmem:[#allocation2 + $0x210] sm:$0xff]  }
 0x51d   :  { %1382 = vmatprep.subr.bf16.mxu0 %v1624_v0 }
 0x520   :  { %1383 = vmatpush3.bf16.msra.mxu0 %v1520_v34  ;;  %v1551_v34 = vld [vmem:[#allocation2 + $0x218] sm:$0xff]  }
 0x521   :  { %1384 = vmatprep.subr.bf16.mxu0 %v1624_v0 }
 0x524   :  { %1385 = vmatpush3.bf16.msra.mxu0 %v1521_v35  ;;  %v1552_v35 = vld [vmem:[#allocation2 + $0x220] sm:$0xff]  }
 0x525   :  { %1386 = vmatprep.subr.bf16.mxu0 %v1624_v0 }
 0x528   :  { %1387 = vmatpush3.bf16.msra.mxu0 %v1522_v44 }
 0x529   :  { %1388 = vmatprep.subr.bf16.mxu0 %v1624_v0 }
 0x52c   :  { %1389 = vmatpush3.bf16.msra.mxu0 %v1523_v45  ;;  %v1554_v45 = vld [vmem:[#allocation2 + $0x230] sm:$0xff]  }
 0x52d   :  { %1414 = vmatprep.subr.bf16.mxu0 %v1624_v0 }
 0x5e2   :  { %v448_v37 = vpop.f32.mrb[4].mxu0 }
 0x5e3   :  { %v449_v38 = vadd.f32 %v1150_v36, %v448_v37  ;;  %v1352_v39 = vpop.f32.mrb[5].mxu0  ;;  %v1553_v36 = vld [vmem:[#allocation2 + $0x228] sm:$0xff]   ;;  %v1186_v37 = vld [vmem:[#allocation4 + $0x26] ss:$0 sm:$0xff] }
 0x5e4   :  { %v451_v40 = vpop.f32.mrb[6].mxu0 }
 0x5e5   :  { %v471_v41 = vmax.f32 %v449_v38, 0.0  ;;  %v1353_v42 = vpop.f32.mrb[7].mxu0 }
 0x5e7   :  { %v472_v43 = vpack.c.bf16 %v471_v41, %v471_v41 }
 0x5e9   :  { %1371 = vmatmul.mubr.bf16.vlgmr.msra.gmra.mrb[4].mxu1 %v472_v43 }
 0x5ea   :  { %1410 = vmatprep.mubr.msk.bf16.mxu1 %vm1625_vm0, %v1624_v0  ;;  %1395 = vmatpush3.bf16.msra.mxu1 %v1524_v46  ;;  %v1555_v46 = vld [vmem:[#allocation2 + $0x238] sm:$0xff]  }
 0x5eb   :  { %1396 = vmatprep.subr.bf16.mxu1 %v1624_v0 }
 0x5ee   :  { %1397 = vmatpush3.bf16.msra.mxu1 %v1525_v47  ;;  %v1195_v47 = vld [vmem:[#allocation4 + $0x27] ss:$0 sm:$0xff] }
 0x5ef   :  { %1398 = vmatprep.subr.bf16.mxu1 %v1624_v0 }
 0x5f2   :  { %1399 = vmatpush3.bf16.msra.mxu1 %v1526_v48 }
 0x5f3   :  { %1400 = vmatprep.subr.bf16.mxu1 %v1624_v0 }
 0x5f6   :  { %1401 = vmatpush3.bf16.msra.mxu1 %v1527_v49 }
 0x5f7   :  { %1402 = vmatprep.subr.bf16.mxu1 %v1624_v0 }
 0x5fa   :  { %1403 = vmatpush3.bf16.msra.mxu1 %v1528_v50 }
 0x5fb   :  { %1404 = vmatprep.subr.bf16.mxu1 %v1624_v0 }
 0x5fe   :  { %1405 = vmatpush3.bf16.msra.mxu1 %v1529_v51 }
 0x5ff   :  { %1406 = vmatprep.subr.bf16.mxu1 %v1624_v0 }
 0x602   :  { %1407 = vmatpush3.bf16.msra.mxu1 %v1530_v60 }
 0x603   :  { %1408 = vmatprep.subr.bf16.mxu1 %v1624_v0 }
 0x606   :  { %1409 = vmatpush3.bf16.msra.mxu1 %v1531_v61 }
 0x607   :  { %1434 = vmatprep.subr.bf16.mxu1 %v1624_v0 }
 0x6bc   :  { %v559_v53 = vpop.f32.mrb[4].mxu1 }
 0x6bd   :  { %v560_v54 = vadd.f32 %v1159_v52, %v559_v53  ;;  %v1372_v55 = vpop.f32.mrb[5].mxu1 }
 0x6be   :  { %v562_v56 = vpop.f32.mrb[6].mxu1  ;;  %v1204_v55 = vld [vmem:[#allocation4 + $0x28] ss:$0 sm:$0xff] }
 0x6bf   :  { %v582_v57 = vmax.f32 %v560_v54, 0.0  ;;  %v1373_v58 = vpop.f32.mrb[7].mxu1 }
 0x6c1   :  { %v583_v59 = vpack.c.bf16 %v582_v57, %v582_v57 }
 0x6c3   :  { %1391 = vmatmul.mubr.bf16.vlgmr.msra.gmra.mrb[8].mxu0 %v583_v59 }
 0x6c4   :  { %1430 = vmatprep.mubr.msk.bf16.mxu0 %vm1625_vm0, %v1624_v0  ;;  %1415 = vmatpush3.bf16.msra.mxu0 %v1532_v62 }
 0x6c5   :  { %1416 = vmatprep.subr.bf16.mxu0 %v1624_v0 }
 0x6c8   :  { %1417 = vmatpush3.bf16.msra.mxu0 %v1533_v63 }
 0x6c9   :  { %1418 = vmatprep.subr.bf16.mxu0 %v1624_v0 }
 0x6cc   :  { %1419 = vmatpush3.bf16.msra.mxu0 %v1534_v1 }
 0x6cd   :  { %1420 = vmatprep.subr.bf16.mxu0 %v1624_v0 }
 0x6d0   :  { %1421 = vmatpush3.bf16.msra.mxu0 %v1535_v2 }
 0x6d1   :  { %1422 = vmatprep.subr.bf16.mxu0 %v1624_v0 }
 0x6d4   :  { %1423 = vmatpush3.bf16.msra.mxu0 %v1536_v3 }
 0x6d5   :  { %1424 = vmatprep.subr.bf16.mxu0 %v1624_v0 }
 0x6d8   :  { %1425 = vmatpush3.bf16.msra.mxu0 %v1537_v4 }
 0x6d9   :  { %1426 = vmatprep.subr.bf16.mxu0 %v1624_v0 }
 0x6dc   :  { %1427 = vmatpush3.bf16.msra.mxu0 %v1538_v13 }
 0x6dd   :  { %1428 = vmatprep.subr.bf16.mxu0 %v1624_v0 }
 0x6e0   :  { %1429 = vmatpush3.bf16.msra.mxu0 %v1539_v14 }
 0x6e1   :  { %1454 = vmatprep.subr.bf16.mxu0 %v1624_v0 }
 0x796   :  { %v670_v6 = vpop.f32.mrb[8].mxu0 }
 0x797   :  { %v671_v7 = vadd.f32 %v1168_v5, %v670_v6  ;;  %v1392_v8 = vpop.f32.mrb[9].mxu0 }
 0x798   :  { %v673_v9 = vpop.f32.mrb[10].mxu0 }
 0x799   :  { %v693_v10 = vmax.f32 %v671_v7, 0.0  ;;  %v1393_v11 = vpop.f32.mrb[11].mxu0 }
 0x79b   :  { %v694_v12 = vpack.c.bf16 %v693_v10, %v693_v10 }
 0x79d   :  { %1411 = vmatmul.mubr.bf16.vlgmr.msra.gmra.mrb[8].mxu1 %v694_v12 }
 0x79e   :  { %1450 = vmatprep.mubr.msk.bf16.mxu1 %vm1625_vm0, %v1624_v0  ;;  %1435 = vmatpush3.bf16.msra.mxu1 %v1540_v15 }
 0x79f   :  { %1436 = vmatprep.subr.bf16.mxu1 %v1624_v0 }
 0x7a2   :  { %1437 = vmatpush3.bf16.msra.mxu1 %v1541_v16 }
 0x7a3   :  { %1438 = vmatprep.subr.bf16.mxu1 %v1624_v0 }
 0x7a6   :  { %1439 = vmatpush3.bf16.msra.mxu1 %v1542_v17 }
 0x7a7   :  { %1440 = vmatprep.subr.bf16.mxu1 %v1624_v0 }
 0x7aa   :  { %1441 = vmatpush3.bf16.msra.mxu1 %v1543_v18 }
 0x7ab   :  { %1442 = vmatprep.subr.bf16.mxu1 %v1624_v0 }
 0x7ae   :  { %1443 = vmatpush3.bf16.msra.mxu1 %v1544_v19 }
 0x7af   :  { %1444 = vmatprep.subr.bf16.mxu1 %v1624_v0 }
 0x7b2   :  { %1445 = vmatpush3.bf16.msra.mxu1 %v1545_v20 }
 0x7b3   :  { %1446 = vmatprep.subr.bf16.mxu1 %v1624_v0 }
 0x7b6   :  { %1447 = vmatpush3.bf16.msra.mxu1 %v1546_v29 }
 0x7b7   :  { %1448 = vmatprep.subr.bf16.mxu1 %v1624_v0 }
 0x7ba   :  { %1449 = vmatpush3.bf16.msra.mxu1 %v1547_v30 }
 0x870   :  { %v781_v22 = vpop.f32.mrb[8].mxu1 }
 0x871   :  { %v782_v23 = vadd.f32 %v1177_v21, %v781_v22  ;;  %v1412_v24 = vpop.f32.mrb[9].mxu1 }
 0x872   :  { %v784_v25 = vpop.f32.mrb[10].mxu1 }
 0x873   :  { %v804_v26 = vmax.f32 %v782_v23, 0.0  ;;  %v1413_v27 = vpop.f32.mrb[11].mxu1 }
 0x875   :  { %v805_v28 = vpack.c.bf16 %v804_v26, %v804_v26 }
 0x877   :  { %1431 = vmatmul.mubr.bf16.vlgmr.msra.gmra.mrb[12].mxu0 %v805_v28 }
 0x878   :  { %1470 = vmatprep.mubr.msk.bf16.mxu0 %vm1625_vm0, %v1624_v0  ;;  %1455 = vmatpush3.bf16.msra.mxu0 %v1548_v31 }
 0x879   :  { %1456 = vmatprep.subr.bf16.mxu0 %v1624_v0 }
 0x87c   :  { %1457 = vmatpush3.bf16.msra.mxu0 %v1549_v32 }
 0x87d   :  { %1458 = vmatprep.subr.bf16.mxu0 %v1624_v0 }
 0x880   :  { %1459 = vmatpush3.bf16.msra.mxu0 %v1550_v33 }
 0x881   :  { %1460 = vmatprep.subr.bf16.mxu0 %v1624_v0 }
 0x884   :  { %1461 = vmatpush3.bf16.msra.mxu0 %v1551_v34 }
 0x885   :  { %1462 = vmatprep.subr.bf16.mxu0 %v1624_v0 }
 0x888   :  { %1463 = vmatpush3.bf16.msra.mxu0 %v1552_v35 }
 0x889   :  { %1464 = vmatprep.subr.bf16.mxu0 %v1624_v0 }
 0x88c   :  { %1465 = vmatpush3.bf16.msra.mxu0 %v1553_v36 }
 0x88d   :  { %1466 = vmatprep.subr.bf16.mxu0 %v1624_v0 }
 0x890   :  { %1467 = vmatpush3.bf16.msra.mxu0 %v1554_v45 }
 0x891   :  { %1468 = vmatprep.subr.bf16.mxu0 %v1624_v0 }
 0x894   :  { %1469 = vmatpush3.bf16.msra.mxu0 %v1555_v46 }
 0x94a   :  { %v892_v38 = vpop.f32.mrb[12].mxu0 }
 0x94b   :  { %v893_v39 = vadd.f32 %v1186_v37, %v892_v38  ;;  %v1432_v40 = vpop.f32.mrb[13].mxu0 }
 0x94c   :  { %v895_v41 = vpop.f32.mrb[14].mxu0 }
 0x94d   :  { %v915_v42 = vmax.f32 %v893_v39, 0.0  ;;  %v1433_v43 = vpop.f32.mrb[15].mxu0 }
 0x94f   :  { %v916_v44 = vpack.c.bf16 %v915_v42, %v915_v42 }
 0x951   :  { %1451 = vmatmul.mubr.bf16.vlgmr.msra.gmra.mrb[12].mxu1 %v916_v44 }
 0xa24   :  { %v1003_v48 = vpop.f32.mrb[12].mxu1 }
 0xa25   :  { %v1004_v49 = vadd.f32 %v1195_v47, %v1003_v48  ;;  %v1452_v50 = vpop.f32.mrb[13].mxu1 }
 0xa26   :  { %v1006_v51 = vpop.f32.mrb[14].mxu1 }
 0xa27   :  { %v1026_v52 = vmax.f32 %v1004_v49, 0.0  ;;  %v1453_v53 = vpop.f32.mrb[15].mxu1 }
 0xa29   :  { %v1027_v54 = vpack.c.bf16 %v1026_v52, %v1026_v52 }
 0xa2b   :  { %1471 = vmatmul.mubr.bf16.vlgmr.msra.gmra.mrb[16].mxu0 %v1027_v54 }
 0xafe   :  { %v1114_v56 = vpop.f32.mrb[16].mxu0 }
 0xaff   :  { %v1115_v57 = vadd.f32 %v1204_v55, %v1114_v56  ;;  %v1472_v58 = vpop.f32.mrb[17].mxu0 }
 0xb00   :  { %v1117_v59 = vpop.f32.mrb[18].mxu0 }
 0xb01   :  { %1120 = vst [vmem:[%s1786_s3] sm:$0xff] %v1115_v57  ;;  %v1473_v0 = vpop.f32.mrb[19].mxu0 }
 0xb02   :  { %1125 = vsyncpa [#allocation3], 1 }
 0xb03   :  { %1126 = vsyncpa [#allocation5], 1 }

</bundles_post_ra>
